<compile_context>
chip_gen: v7x
topology: tpu7x:2x2x1
jax: 0.10.0
libtpu: 0.0.40
codegen_flags: <defaults>
</compile_context>

<pallas_src>
import functools

import jax
import jax.numpy as jnp
from jax.experimental import pallas as pl
from jax.experimental.pallas import tpu as pltpu


def _round_up(x: int, m: int) -> int:
    return (x + m - 1) // m * m


def tl_prs_kernel(x_ref, w_ref, bias_ref, out_ref):
    # x_ref:    [TB, F]   VMEM  (TB samples, F = n_input + n_cov packed features)
    # w_ref:    [8, F]    VMEM  (combined weight row, replicated to 8 sublanes)
    # bias_ref: [1]       SMEM  (summed bias of the four Linear layers)
    # out_ref:  [1, 1, TB]      (lane-dense output row for this batch tile)
    s = jax.lax.dot_general(
        w_ref[...], x_ref[...],
        dimension_numbers=(((1,), (1,)), ((), ())),   # contract feature axis
        preferred_element_type=jnp.float32,
        precision=jax.lax.Precision.HIGHEST,          # true f32 on the MXU
    )                                                 # [8, TB], rows identical
    out_ref[0] = s[0:1, :] + bias_ref[0]


def tl_prs_prepare(G, C, w_beta, w_tau, w_gamma, w_delta, biases,
                   *, block_rows=2048):
    """One-time packing of inputs/params (hoisted out of the hot loop)."""
    B = G.shape[0]
    parts_x = [G.astype(jnp.float32)]
    parts_w = [(w_beta + w_tau).astype(jnp.float32)]
    if C is not None and C.shape[-1] > 0:
        parts_x.append(C.astype(jnp.float32))
        parts_w.append((w_gamma + w_delta).astype(jnp.float32))
    X = jnp.concatenate(parts_x, axis=-1)                    # [B, F]
    w = jnp.concatenate(parts_w, axis=-1)                    # [1, F]
    w8 = jnp.tile(w, (8, 1))                                 # [8, F] (MXU-friendly M)
    bias_total = jnp.sum(biases).reshape(1).astype(jnp.float32)   # [1] -> SMEM

    # Batch tile: multiple of 128 (lane-dense output row), capped at block_rows.
    TB = int(min(block_rows, max(128, _round_up(B, 128))))
    TB = _round_up(TB, 128)
    B_pad = _round_up(B, TB)
    if B_pad != B:
        X = jnp.pad(X, ((0, B_pad - B), (0, 0)))             # zero rows, sliced off later
    return X, w8, bias_total, TB


def tl_prs_forward(X, w8, bias_total, TB, B):
    """Hot path: gridded, pipelined pallas_call."""
    B_pad, F = X.shape
    num_tiles = B_pad // TB

    out = pl.pallas_call(
        tl_prs_kernel,
        out_shape=jax.ShapeDtypeStruct((num_tiles, 1, TB), jnp.float32),
        grid=(num_tiles,),
        in_specs=[
            pl.BlockSpec((TB, F), lambda i: (i, 0)),            # batch tile of X
            pl.BlockSpec((8, F), lambda i: (0, 0)),             # folded weights (resident)
            pl.BlockSpec(memory_space=pltpu.MemorySpace.SMEM),  # scalar bias
        ],
        out_specs=pl.BlockSpec((1, 1, TB), lambda i: (i, 0, 0)),
        compiler_params=pltpu.CompilerParams(
            dimension_semantics=("parallel",),   # v7x: split batch tiles over both TCs
        ),
        cost_estimate=pl.CostEstimate(
            flops=2 * B_pad * F,
            transcendentals=0,
            bytes_accessed=4 * (B_pad * F + B_pad + 8 * F + 1),
        ),
    )(X, w8, bias_total)

    # [num_tiles, 1, TB] -> [B_pad, 1] -> drop padding rows.
    return out.reshape(B_pad, 1)[:B]


def tl_prs(G, C, w_beta, w_tau, w_gamma, w_delta, biases, *, block_rows=2048):
    X, w8, bias_total, TB = tl_prs_prepare(
        G, C, w_beta, w_tau, w_gamma, w_delta, biases, block_rows=block_rows)
    return tl_prs_forward(X, w8, bias_total, TB, G.shape[0])


def tl_prs_reference(G, C, w_beta, w_tau, w_gamma, w_delta, biases):
    # Plain-JAX reference mirroring the PyTorch forward (pure f32 mul+sum).
    out = (jnp.sum(G * (w_beta + w_tau), axis=-1, keepdims=True))
    if C is not None and C.shape[-1] > 0:
        out = out + jnp.sum(C * (w_gamma + w_delta), axis=-1, keepdims=True)
    return out + jnp.sum(biases)


if __name__ == "__main__":
    B, n_input, n_cov = 8, 32, 4
    key = jax.random.PRNGKey(0)
    keys = jax.random.split(key, 10)

    # Deterministic nn.Linear-style init: uniform(-1/sqrt(fan_in), +1/sqrt(fan_in)).
    bound_g = 1.0 / jnp.sqrt(jnp.float32(n_input))
    bound_c = 1.0 / jnp.sqrt(jnp.float32(n_cov))

    G = jax.random.normal(keys[0], (B, n_input), dtype=jnp.float32)
    C = jax.random.normal(keys[1], (B, n_cov), dtype=jnp.float32)

    w_beta  = jax.random.uniform(keys[2], (1, n_input), jnp.float32, -bound_g, bound_g)
    w_tau   = jax.random.uniform(keys[3], (1, n_input), jnp.float32, -bound_g, bound_g)
    w_gamma = jax.random.uniform(keys[4], (1, n_cov),   jnp.float32, -bound_c, bound_c)
    w_delta = jax.random.uniform(keys[5], (1, n_cov),   jnp.float32, -bound_c, bound_c)

    b_beta  = jax.random.uniform(keys[6], (1,), jnp.float32, -bound_g, bound_g)
    b_tau   = jax.random.uniform(keys[7], (1,), jnp.float32, -bound_g, bound_g)
    b_gamma = jax.random.uniform(keys[8], (1,), jnp.float32, -bound_c, bound_c)
    b_delta = jax.random.uniform(keys[9], (1,), jnp.float32, -bound_c, bound_c)
    biases = jnp.concatenate([b_beta, b_tau, b_gamma, b_delta])   # [4]

    run = jax.jit(functools.partial(tl_prs, block_rows=2048))
    out = run(G, C, w_beta, w_tau, w_gamma, w_delta, biases)
    out = jax.block_until_ready(out)

    ref = tl_prs_reference(G, C, w_beta, w_tau, w_gamma, w_delta, biases)
    assert out.shape == (B, 1), out.shape
    assert jnp.allclose(out, ref, atol=1e-4, rtol=1e-4), (out, ref)

    print("KERNEL_OK")
</pallas_src>

<mosaic_0001>
module attributes {stable_mosaic.version = 11 : i64} {
  func.func @tl_prs_kernel(%arg0: i32, %arg1: memref<128x36xf32, #tpu.memory_space<vmem>>, %arg2: memref<8x36xf32, #tpu.memory_space<vmem>>, %arg3: memref<1xf32, #tpu.memory_space<smem>>, %arg4: memref<1x1x128xf32, #tpu.memory_space<vmem>>) attributes {dimension_semantics = [#tpu.dimension_semantics<parallel>], iteration_bounds = array<i64: 1>, scalar_prefetch = 0 : i64, scratch_operands = 0 : i64, tpu.core_type = #tpu.core_type<tc>, window_params = [{transform_indices = @transform_0, window_bounds = array<i64: 128, 36>}, {pipeline_mode = #tpu.pipeline_mode<synchronous>, transform_indices = @transform_1, window_bounds = array<i64: 8, 36>}, {transform_indices = @transform_2, window_bounds = array<i64: 1>}, {transform_indices = @transform_3, window_bounds = array<i64: 1, 1, 128>}]} {
    %c0 = arith.constant 0 : index
    %c0_0 = arith.constant 0 : index
    %0 = vector.load %arg2[%c0, %c0_0] : memref<8x36xf32, #tpu.memory_space<vmem>>, vector<8x36xf32>
    %c0_1 = arith.constant 0 : index
    %c0_2 = arith.constant 0 : index
    %1 = vector.load %arg1[%c0_1, %c0_2] : memref<128x36xf32, #tpu.memory_space<vmem>>, vector<128x36xf32>
    %cst = arith.constant dense<0.000000e+00> : vector<8x128xf32>
    %2 = tpu.matmul %0, %1, %cst {dimension_numbers = #tpu.dot_dimension_numbers<[1], [1], [0], [0], [0, 0, 1, 0], [], []>, precision = #tpu.contract_precision<fp32>} : vector<8x36xf32>, vector<128x36xf32>, vector<8x128xf32> -> vector<8x128xf32>
    %3 = vector.extract_strided_slice %2 {offsets = [0, 0], sizes = [1, 128], strides = [1, 1]} : vector<8x128xf32> to vector<1x128xf32>
    %c0_3 = arith.constant 0 : index
    %4 = memref.load %arg3[%c0_3] : memref<1xf32, #tpu.memory_space<smem>>
    %5 = vector.broadcast %4 : f32 to vector<1x128xf32>
    %6 = arith.addf %3, %5 : vector<1x128xf32>
    %c0_4 = arith.constant 0 : index
    %c0_5 = arith.constant 0 : index
    %c0_6 = arith.constant 0 : index
    %7 = vector.load %arg4[%c0_4, %c0_5, %c0_6] : memref<1x1x128xf32, #tpu.memory_space<vmem>>, vector<1x1x128xf32>
    %8 = vector.shape_cast %7 : vector<1x1x128xf32> to vector<1x128xf32>
    %9 = vector.shape_cast %6 : vector<1x128xf32> to vector<1x1x128xf32>
    tpu.vector_store %arg4[%c0_4, %c0_5, %c0_6], %9 {strides = array<i32>} : memref<1x1x128xf32, #tpu.memory_space<vmem>>, vector<1x1x128xf32>,
    return
  }
  func.func @transform_0(%arg0: i32) -> (i32, i32) {
    %c0_i32 = arith.constant 0 : i32
    %c0_i32_0 = arith.constant 0 : i32
    return %arg0, %c0_i32 : i32, i32
  }
  func.func @transform_1(%arg0: i32) -> (i32, i32) {
    %c0_i32 = arith.constant 0 : i32
    %c0_i32_0 = arith.constant 0 : i32
    %c0_i32_1 = arith.constant 0 : i32
    return %c0_i32, %c0_i32_0 : i32, i32
  }
  func.func @transform_2(%arg0: i32) -> i32 {
    %c0_i32 = arith.constant 0 : i32
    %c0_i32_0 = arith.constant 0 : i32
    return %c0_i32 : i32
  }
  func.func @transform_3(%arg0: i32) -> (i32, i32, i32) {
    %c0_i32 = arith.constant 0 : i32
    %c0_i32_0 = arith.constant 0 : i32
    %c0_i32_1 = arith.constant 0 : i32
    return %arg0, %c0_i32, %c0_i32_0 : i32, i32, i32
  }
}

</mosaic_0001>

<bundles_post_ra>
// kernel: tl_prs.1
= control target key start
LH: loop header
LB: loop body
LE: loop exit
PB: predicated region body
PF: predicated region fallthrough
CT: control target
= control target key end

     0   :  { %vm32_vm0 = vcmask 293888   ;;  %v1192_v0 = vmov 0.0|0.0   ;;  %vm1193_vm1 = vmmov 0   ;;  %v1194_v10 = vmov 0.0   ;;  %s1524_s0 = inlined_call_operand.vmem [shape: f32[128,36], index: 0, kind: input, shape index: {}]   ;;  %s1525_s1 = inlined_call_operand.vmem [shape: f32[8,36], index: 1, kind: input, shape index: {}]   ;;  %s1526_s2 = inlined_call_operand.<no memory space> [shape: f32[1], index: 2, kind: input, shape index: {}]   ;;  %s1527_s3 = inlined_call_operand.vmem [shape: f32[1,1,128], index: 3, kind: output, shape index: {}]  }
   0x1   :  { %1045 = vmatprep.subr.bf16.mxu0 %v1192_v0  ;;  %v16_v1 = vld [vmem:[%s1524_s0] sm:$0xff]  ;;  %v17_v2 = vld [vmem:[%s1524_s0 + $0x8] sm:$0xff]  ;;  %1069 = vmatprep.subr.bf16.mxu1 %v1192_v0  ;;  %v18_v3 = vld [vmem:[%s1524_s0 + $0x10] sm:$0xff] }
   0x2   :  { %v37_v4 = vsel %vm32_vm0, %v16_v1, 0  ;;  %v40_v5 = vsel %vm32_vm0, %v17_v2, 0  ;;  %v19_v6 = vld [vmem:[%s1524_s0 + $0x18] sm:$0xff]  ;;  %v43_v7 = vsel %vm32_vm0, %v18_v3, 0  ;;  %v20_v8 = vld [vmem:[%s1524_s0 + $0x20] sm:$0xff]  ;;  %v21_v9 = vld [vmem:[%s1524_s0 + $0x28] sm:$0xff]  ;;  %867 = vmatprep.mubr.msk.f32.mxu0 %vm1193_vm1, %v1194_v10  ;;  %902 = vmatprep.mubr.msk.f32.mxu1 %vm1193_vm1, %v1194_v10 }
   0x3   :  { %v85_v11 = vand.u32 4294901760, %v37_v4  ;;  %v88_v12 = vand.u32 4294901760, %v40_v5  ;;  %v46_v13 = vsel %vm32_vm0, %v19_v6, 0  ;;  %v91_v14 = vand.u32 4294901760, %v43_v7  ;;  %v22_v25 = vld [vmem:[%s1524_s0 + $0x30] sm:$0xff]  ;;  %v23_v29 = vld [vmem:[%s1524_s0 + $0x38] sm:$0xff] }
   0x4   :  { %v94_v15 = vand.u32 4294901760, %v46_v13  ;;  %v49_v16 = vsel %vm32_vm0, %v20_v8, 0  ;;  %v52_v17 = vsel %vm32_vm0, %v21_v9, 0  ;;  %v55_v33 = vsel %vm32_vm0, %v22_v25, 0  ;;  %v24_v49 = vld [vmem:[%s1524_s0 + $0x40] sm:$0xff]  ;;  %v25_v50 = vld [vmem:[%s1524_s0 + $0x48] sm:$0xff] }
   0x5   :  { %v1245_v18 = vpack.c.bf16 %v88_v12, %v85_v11  ;;  %v1247_v19 = vsub.f32 %v37_v4, %v85_v11  ;;  %v1249_v20 = vsub.f32 %v40_v5, %v88_v12  ;;  %v1251_v21 = vsub.f32 %v43_v7, %v91_v14  ;;  %v26_v2 = vld [vmem:[%s1524_s0 + $0x50] sm:$0xff]  ;;  %v27_v3 = vld [vmem:[%s1524_s0 + $0x58] sm:$0xff] }
   0x6   :  { %v1253_v22 = vsub.f32 %v46_v13, %v94_v15  ;;  %v97_v23 = vand.u32 4294901760, %v49_v16  ;;  %v100_v24 = vand.u32 4294901760, %v52_v17  ;;  %v1274_v34 = vpack.c.bf16 %v94_v15, %v91_v14  ;;  %v28_v15 = vld [vmem:[%s1524_s0 + $0x60] sm:$0xff] }
   0x7   :  { %1047 = vmatpush3.bf16.xpose.msra.mxu0 %v1245_v18  ;;  %v178_v26 = vand.u32 4294901760, %v1247_v19  ;;  %v185_v27 = vand.u32 4294901760, %v1249_v20  ;;  %v192_v28 = vand.u32 4294901760, %v1251_v21  ;;  %v58_v37 = vsel %vm32_vm0, %v23_v29, 0  ;;  %v29_v29 = vld [vmem:[%s1524_s0 + $0x68] sm:$0xff] }
   0x8   :  { %1048 = vmatprep.subr.bf16.mxu0 %v1192_v0  ;;  %v199_v30 = vand.u32 4294901760, %v1253_v22  ;;  %v1276_v35 = vsub.f32 %v49_v16, %v97_v23  ;;  %v1278_v36 = vsub.f32 %v52_v17, %v100_v24  ;;  %v103_v43 = vand.u32 4294901760, %v55_v33 }
   0x9   :  { %v179_v31 = vsub.f32 %v1247_v19, %v178_v26  ;;  %v186_v32 = vsub.f32 %v1249_v20, %v185_v27  ;;  %v193_v40 = vsub.f32 %v1251_v21, %v192_v28  ;;  %v106_v44 = vand.u32 4294901760, %v58_v37 }
   0xa   :  { %v200_v41 = vsub.f32 %v1253_v22, %v199_v30  ;;  %v206_v45 = vand.u32 4294901760, %v1276_v35  ;;  %v213_v48 = vand.u32 4294901760, %v1278_v36  ;;  %v1298_v51 = vpack.c.bf16 %v100_v24, %v97_v23 }
   0xb   :  { %v180_v38 = vand.u32 4294901760, %v179_v31  ;;  %v187_v39 = vand.u32 4294901760, %v186_v32  ;;  %v194_v46 = vand.u32 4294901760, %v193_v40  ;;  %v1300_v52 = vsub.f32 %v55_v33, %v103_v43 }
   0xc   :  { %v201_v47 = vand.u32 4294901760, %v200_v41  ;;  %v1302_v53 = vsub.f32 %v58_v37, %v106_v44  ;;  %v207_v54 = vsub.f32 %v1276_v35, %v206_v45  ;;  %v214_v56 = vsub.f32 %v1278_v36, %v213_v48 }
   0xd   :  { %v1070_v42 = vpack.c.bf16 %v187_v39, %v180_v38  ;;  %v61_v57 = vsel %vm32_vm0, %v24_v49, 0  ;;  %v64_v58 = vsel %vm32_vm0, %v25_v50, 0  ;;  %v220_v63 = vand.u32 4294901760, %v1300_v52  ;;  %v31_v49 = vld [vmem:[%s1524_s0 + $0x78] sm:$0xff] }
   0xe   :  { %v1073_v55 = vpack.c.bf16 %v201_v47, %v194_v46  ;;  %v109_v59 = vand.u32 4294901760, %v61_v57  ;;  %v112_v60 = vand.u32 4294901760, %v64_v58  ;;  %v208_v61 = vand.u32 4294901760, %v207_v54 }
   0xf   :  { %1050 = vmatpush3.bf16.xpose.msra.mxu0 %v1274_v34  ;;  %1071 = vmatpush3.bf16.xpose.msra.mxu1 %v1070_v42  ;;  %v215_v62 = vand.u32 4294901760, %v214_v56  ;;  %v227_v1 = vand.u32 4294901760, %v1302_v53  ;;  %v1319_v4 = vpack.c.bf16 %v106_v44, %v103_v43  ;;  %v67_v7 = vsel %vm32_vm0, %v26_v2, 0 }
  0x10   :  { %1051 = vmatprep.subr.bf16.mxu0 %v1192_v0  ;;  %1072 = vmatprep.subr.bf16.mxu1 %v1192_v0  ;;  %v1321_v5 = vsub.f32 %v61_v57, %v109_v59  ;;  %v1323_v6 = vsub.f32 %v64_v58, %v112_v60  ;;  %v221_v9 = vsub.f32 %v1300_v52, %v220_v63  ;;  %v70_v12 = vsel %vm32_vm0, %v27_v3, 0 }
  0x11   :  { %v1076_v8 = vpack.c.bf16 %v215_v62, %v208_v61  ;;  %v228_v11 = vsub.f32 %v1302_v53, %v227_v1  ;;  %v115_v13 = vand.u32 4294901760, %v67_v7  ;;  %v118_v14 = vand.u32 4294901760, %v70_v12  ;;  %v15_v62 = vld [vmem:[%s1525_s1] sm:$0xff] }
  0x12   :  { %v222_v16 = vand.u32 4294901760, %v221_v9  ;;  %v234_v23 = vand.u32 4294901760, %v1321_v5  ;;  %v241_v24 = vand.u32 4294901760, %v1323_v6  ;;  %v1337_v25 = vpack.c.bf16 %v112_v60, %v109_v59 }
  0x13   :  { %v229_v17 = vand.u32 4294901760, %v228_v11  ;;  %v1342_v31 = vsub.f32 %v67_v7, %v115_v13  ;;  %v73_v32 = vsel %vm32_vm0, %v28_v15, 0  ;;  %v1349_v33 = vpack.c.bf16 %v185_v27, %v178_v26 }
  0x14   :  { %v1355_v37 = vpack.c.bf16 %v199_v30, %v192_v28  ;;  %v1357_v38 = vsub.f32 %v70_v12, %v118_v14  ;;  %v1359_v39 = vpack.c.bf16 %v213_v48, %v206_v45  ;;  %v1361_v40 = vpack.c.bf16 %v227_v1, %v220_v63  ;;  %v30_v48 = vld [vmem:[%s1524_s0 + $0x70] sm:$0xff] }
  0x15   :  { %v1363_v41 = vpack.c.bf16 %v241_v24, %v234_v23  ;;  %v1079_v42 = vpack.c.bf16 %v229_v17, %v222_v16  ;;  %v235_v43 = vsub.f32 %v1321_v5, %v234_v23  ;;  %v242_v26 = vsub.f32 %v1323_v6, %v241_v24 }
  0x16   :  { %v76_v27 = vsel %vm32_vm0, %v29_v29, 0  ;;  %v121_v44 = vand.u32 4294901760, %v73_v32  ;;  %v248_v28 = vand.u32 4294901760, %v1342_v31  ;;  %v255_v30 = vand.u32 4294901760, %v1357_v38 }
  0x17   :  { %1053 = vmatpush3.bf16.xpose.msra.mxu0 %v1298_v51  ;;  %1074 = vmatpush3.bf16.xpose.msra.mxu1 %v1073_v55  ;;  %v124_v46 = vand.u32 4294901760, %v76_v27  ;;  %v236_v45 = vand.u32 4294901760, %v235_v43  ;;  %v243_v47 = vand.u32 4294901760, %v242_v26  ;;  %v1381_v54 = vpack.c.bf16 %v118_v14, %v115_v13 }
  0x18   :  { %1054 = vmatprep.subr.bf16.mxu0 %v1192_v0  ;;  %1075 = vmatprep.subr.bf16.mxu1 %v1192_v0  ;;  %v1379_v50 = vpack.c.bf16 %v255_v30, %v248_v28  ;;  %v1383_v55 = vsub.f32 %v73_v32, %v121_v44  ;;  %v79_v57 = vsel %vm32_vm0, %v30_v48, 0  ;;  %v249_v59 = vsub.f32 %v1342_v31, %v248_v28 }
  0x19   :  { %v1385_v56 = vsub.f32 %v76_v27, %v124_v46  ;;  %v1082_v58 = vpack.c.bf16 %v243_v47, %v236_v45  ;;  %v256_v60 = vsub.f32 %v1357_v38, %v255_v30  ;;  %v82_v61 = vsel %vm32_vm0, %v31_v49, 0 }
  0x1a   :  { %v127_v63 = vand.u32 4294901760, %v79_v57  ;;  %v130_v1 = vand.u32 4294901760, %v82_v61  ;;  %v262_v2 = vand.u32 4294901760, %v1383_v55  ;;  %v250_v7 = vand.u32 4294901760, %v249_v59 }
  0x1b   :  { %v269_v3 = vand.u32 4294901760, %v1385_v56  ;;  %v34_v9 = vsel %vm32_vm0, %v15_v62, 0  ;;  %v1408_v15 = vpack.c.bf16 %v124_v46, %v121_v44  ;;  %v1097_v59 = vpack.c.bf16 %v1253_v22, %v1251_v21 }
  0x1c   :  { %v1402_v12 = vsub.f32 %v79_v57, %v127_v63  ;;  %v1404_v13 = vsub.f32 %v82_v61, %v130_v1  ;;  %v1406_v14 = vand.u32 4294901760, %v34_v9  ;;  %v263_v17 = vsub.f32 %v1383_v55, %v262_v2 }
  0x1d   :  { %v1400_v11 = vpack.c.bf16 %v269_v3, %v262_v2  ;;  %v270_v23 = vsub.f32 %v1385_v56, %v269_v3  ;;  %v1423_v44 = vpack.c.bf16 %v130_v1, %v127_v63  ;;  %v1106_v21 = vpack.c.bf16 %v1323_v6, %v1321_v5 }
  0x1e   :  { %v1413_v24 = vsub.f32 %v34_v9, %v1406_v14  ;;  %v276_v29 = vand.u32 4294901760, %v1402_v12  ;;  %v283_v32 = vand.u32 4294901760, %v1404_v13  ;;  %v1109_v22 = vpack.c.bf16 %v1357_v38, %v1342_v31 }
  0x1f   :  { %1056 = vmatpush3.bf16.xpose.msra.mxu0 %v1319_v4  ;;  %1077 = vmatpush3.bf16.xpose.msra.mxu1 %v1076_v8  ;;  %v257_v8 = vand.u32 4294901760, %v256_v60  ;;  %v271_v43 = vand.u32 4294901760, %v270_v23 }
  0x20   :  { %1057 = vmatprep.subr.bf16.mxu0 %v1192_v0  ;;  %1078 = vmatprep.subr.bf16.mxu1 %v1192_v0  ;;  %v1420_v26 = vpack.c.bf16 %v283_v32, %v276_v29  ;;  %v167_v27 = vand.u32 4294901760, %v1413_v24  ;;  %v277_v28 = vsub.f32 %v1402_v12, %v276_v29  ;;  %v284_v30 = vsub.f32 %v1404_v13, %v283_v32 }
  0x21   :  { %v1085_v16 = vpack.c.bf16 %v257_v8, %v250_v7 }
  0x22   :  { %v168_v45 = vsub.f32 %v1413_v24, %v167_v27  ;;  %v278_v47 = vand.u32 4294901760, %v277_v28  ;;  %v285_v48 = vand.u32 4294901760, %v284_v30 }
  0x24   :  { %v169_v49 = vand.u32 4294901760, %v168_v45  ;;  %v1091_v57 = vpack.c.bf16 %v285_v48, %v278_v47 }
  0x27   :  { %1059 = vmatpush3.bf16.xpose.msra.mxu0 %v1337_v25  ;;  %1080 = vmatpush3.bf16.xpose.msra.mxu1 %v1079_v42  ;;  %v264_v42 = vand.u32 4294901760, %v263_v17 }
  0x28   :  { %1060 = vmatprep.subr.bf16.mxu0 %v1192_v0  ;;  %1081 = vmatprep.subr.bf16.mxu1 %v1192_v0 }
  0x29   :  { %v1088_v46 = vpack.c.bf16 %v271_v43, %v264_v42 }
  0x2f   :  { %1062 = vmatpush3.bf16.xpose.msra.mxu0 %v1381_v54  ;;  %1083 = vmatpush3.bf16.xpose.msra.mxu1 %v1082_v58  ;;  %v1094_v58 = vpack.c.bf16 %v1249_v20, %v1247_v19  ;;  %v1100_v19 = vpack.c.bf16 %v1278_v36, %v1276_v35  ;;  %v1103_v20 = vpack.c.bf16 %v1302_v53, %v1300_v52 }
  0x30   :  { %1063 = vmatprep.subr.bf16.mxu0 %v1192_v0  ;;  %1084 = vmatprep.subr.bf16.mxu1 %v1192_v0  ;;  %v1112_v35 = vpack.c.bf16 %v1385_v56, %v1383_v55  ;;  %v1115_v36 = vpack.c.bf16 %v1404_v13, %v1402_v12 }
  0x37   :  { %1065 = vmatpush3.bf16.xpose.msra.mxu0 %v1408_v15  ;;  %1086 = vmatpush3.bf16.xpose.msra.mxu1 %v1085_v16 }
  0x38   :  { %1066 = vmatprep.subr.bf16.mxu0 %v1192_v0  ;;  %1087 = vmatprep.subr.bf16.mxu1 %v1192_v0 }
  0x3f   :  { %1068 = vmatpush3.bf16.xpose.msra.mxu0 %v1423_v44  ;;  %1089 = vmatpush3.bf16.xpose.msra.mxu1 %v1088_v46 }
  0x40   :  { %1090 = vmatprep.subr.bf16.mxu1 %v1192_v0  ;;  %1093 = vmatprep.subr.bf16.mxu0 %v1192_v0 }
  0x46   :  { %868 = vmatmul.mubr.f32.vlgmr.msra.gmra.mrb[0].mxu0 %v169_v49 }
  0x47   :  { %1092 = vmatpush3.bf16.xpose.msra.mxu1 %v1091_v57  ;;  %1095 = vmatpush3.bf16.xpose.msra.mxu0 %v1094_v58 }
  0x48   :  { %1096 = vmatprep.subr.bf16.mxu0 %v1192_v0  ;;  %1117 = vmatprep.subr.bf16.mxu1 %v1192_v0 }
  0x49   :  { %937 = vmatprep.mubr.msk.f32.mxu0 %vm1193_vm1, %v1194_v10 }
  0x4e   :  { %903 = vmatmul.mubr.f32.vlgmr.msra.gmra.mrb[0].mxu1 %v1406_v14 }
  0x4f   :  { %1098 = vmatpush3.bf16.xpose.msra.mxu0 %v1097_v59  ;;  %1119 = vmatpush3.bf16.xpose.msra.mxu1 %v1245_v18 }
  0x50   :  { %1099 = vmatprep.subr.bf16.mxu0 %v1192_v0  ;;  %1120 = vmatprep.subr.bf16.mxu1 %v1192_v0 }
  0x51   :  { %972 = vmatprep.mubr.msk.f32.mxu1 %vm1193_vm1, %v1194_v10 }
  0x57   :  { %1101 = vmatpush3.bf16.xpose.msra.mxu0 %v1100_v19  ;;  %1122 = vmatpush3.bf16.xpose.msra.mxu1 %v1274_v34 }
  0x58   :  { %1102 = vmatprep.subr.bf16.mxu0 %v1192_v0  ;;  %1123 = vmatprep.subr.bf16.mxu1 %v1192_v0 }
  0x5f   :  { %1104 = vmatpush3.bf16.xpose.msra.mxu0 %v1103_v20  ;;  %1125 = vmatpush3.bf16.xpose.msra.mxu1 %v1298_v51 }
  0x60   :  { %1105 = vmatprep.subr.bf16.mxu0 %v1192_v0  ;;  %1126 = vmatprep.subr.bf16.mxu1 %v1192_v0 }
  0x67   :  { %1107 = vmatpush3.bf16.xpose.msra.mxu0 %v1106_v21  ;;  %1128 = vmatpush3.bf16.xpose.msra.mxu1 %v1319_v4 }
  0x68   :  { %1108 = vmatprep.subr.bf16.mxu0 %v1192_v0  ;;  %1129 = vmatprep.subr.bf16.mxu1 %v1192_v0 }
  0x6f   :  { %1110 = vmatpush3.bf16.xpose.msra.mxu0 %v1109_v22  ;;  %1131 = vmatpush3.bf16.xpose.msra.mxu1 %v1337_v25 }
  0x70   :  { %1111 = vmatprep.subr.bf16.mxu0 %v1192_v0  ;;  %1132 = vmatprep.subr.bf16.mxu1 %v1192_v0 }
  0x77   :  { %1113 = vmatpush3.bf16.xpose.msra.mxu0 %v1112_v35  ;;  %1134 = vmatpush3.bf16.xpose.msra.mxu1 %v1381_v54 }
  0x78   :  { %1114 = vmatprep.subr.bf16.mxu0 %v1192_v0  ;;  %1135 = vmatprep.subr.bf16.mxu1 %v1192_v0 }
  0x7f   :  { %1116 = vmatpush3.bf16.xpose.msra.mxu0 %v1115_v36  ;;  %1137 = vmatpush3.bf16.xpose.msra.mxu1 %v1408_v15 }
  0x80   :  { %1138 = vmatprep.subr.bf16.mxu1 %v1192_v0  ;;  %1141 = vmatprep.subr.bf16.mxu0 %v1192_v0 }
  0x86   :  { %938 = vmatmul.mubr.f32.vlgmr.msra.gmra.mrb[2].mxu0 %v1413_v24 }
  0x87   :  { %1140 = vmatpush3.bf16.xpose.msra.mxu1 %v1423_v44  ;;  %1143 = vmatpush3.bf16.xpose.msra.mxu0 %v1349_v33 }
  0x88   :  { %1144 = vmatprep.subr.bf16.mxu0 %v1192_v0  ;;  %1165 = vmatprep.subr.bf16.mxu1 %v1192_v0 }
  0x89   :  { %1007 = vmatprep.mubr.msk.f32.mxu0 %vm1193_vm1, %v1194_v10 }
  0x8e   :  { %973 = vmatmul.mubr.f32.vlgmr.msra.gmra.mrb[2].mxu1 %v167_v27 }
  0x8f   :  { %1146 = vmatpush3.bf16.xpose.msra.mxu0 %v1355_v37  ;;  %1167 = vmatpush3.bf16.xpose.msra.mxu1 %v1245_v18 }
  0x90   :  { %1147 = vmatprep.subr.bf16.mxu0 %v1192_v0  ;;  %1168 = vmatprep.subr.bf16.mxu1 %v1192_v0 }
  0x91   :  { %1042 = vmatprep.mubr.msk.f32.mxu1 %vm1193_vm1, %v1194_v10 }
  0x97   :  { %1149 = vmatpush3.bf16.xpose.msra.mxu0 %v1359_v39  ;;  %1170 = vmatpush3.bf16.xpose.msra.mxu1 %v1274_v34  ;;  %v726_v39 = vstv %s1526_s2 }
  0x98   :  { %1150 = vmatprep.subr.bf16.mxu0 %v1192_v0  ;;  %1171 = vmatprep.subr.bf16.mxu1 %v1192_v0 }
  0x9f   :  { %1152 = vmatpush3.bf16.xpose.msra.mxu0 %v1361_v40  ;;  %1173 = vmatpush3.bf16.xpose.msra.mxu1 %v1298_v51 }
  0xa0   :  { %1153 = vmatprep.subr.bf16.mxu0 %v1192_v0  ;;  %1174 = vmatprep.subr.bf16.mxu1 %v1192_v0 }
  0xa7   :  { %1155 = vmatpush3.bf16.xpose.msra.mxu0 %v1363_v41  ;;  %1176 = vmatpush3.bf16.xpose.msra.mxu1 %v1319_v4 }
  0xa8   :  { %1156 = vmatprep.subr.bf16.mxu0 %v1192_v0  ;;  %1177 = vmatprep.subr.bf16.mxu1 %v1192_v0 }
  0xaf   :  { %1158 = vmatpush3.bf16.xpose.msra.mxu0 %v1379_v50  ;;  %1179 = vmatpush3.bf16.xpose.msra.mxu1 %v1337_v25 }
  0xb0   :  { %1159 = vmatprep.subr.bf16.mxu0 %v1192_v0  ;;  %1180 = vmatprep.subr.bf16.mxu1 %v1192_v0 }
  0xb7   :  { %1161 = vmatpush3.bf16.xpose.msra.mxu0 %v1400_v11  ;;  %1182 = vmatpush3.bf16.xpose.msra.mxu1 %v1381_v54 }
  0xb8   :  { %1162 = vmatprep.subr.bf16.mxu0 %v1192_v0  ;;  %1183 = vmatprep.subr.bf16.mxu1 %v1192_v0 }
  0xbf   :  { %1164 = vmatpush3.bf16.xpose.msra.mxu0 %v1420_v26  ;;  %1185 = vmatpush3.bf16.xpose.msra.mxu1 %v1408_v15 }
  0xc0   :  { %1186 = vmatprep.subr.bf16.mxu1 %v1192_v0 }
  0xc6   :  { %1008 = vmatmul.mubr.f32.vlgmr.msra.gmra.mrb[4].mxu0 %v1406_v14 }
  0xc7   :  { %1188 = vmatpush3.bf16.xpose.msra.mxu1 %v1423_v44 }
  0xce   :  { %1043 = vmatmul.mubr.f32.vlgmr.msra.gmra.mrb[4].mxu1 %v1406_v14 }
 0x119   :  { %v171_v10 = vpop.f32.mrb[0].mxu0 }
 0x11a   :  { %v869_v18 = vpop.f32.mrb[1].mxu0 }
 0x121   :  { %v322_v34 = vpop.f32.mrb[0].mxu1 }
 0x122   :  { %v323_v51 = vadd.f32 %v322_v34, %v171_v10  ;;  %v904_v52 = vpop.f32.mrb[1].mxu1 }
 0x159   :  { %v426_v53 = vpop.f32.mrb[2].mxu0 }
 0x15a   :  { %v427_v4 = vadd.f32 %v426_v53, %v323_v51  ;;  %v939_v5 = vpop.f32.mrb[3].mxu0 }
 0x161   :  { %v515_v6 = vpop.f32.mrb[2].mxu1 }
 0x162   :  { %v516_v25 = vadd.f32 %v515_v6, %v427_v4  ;;  %v974_v31 = vpop.f32.mrb[3].mxu1 }
 0x199   :  { %v634_v33 = vpop.f32.mrb[4].mxu0 }
 0x19a   :  { %v635_v37 = vadd.f32 %v634_v33, %v516_v25  ;;  %v1009_v0 = vpop.f32.mrb[5].mxu0 }
 0x1a1   :  { %v721_v38 = vpop.f32.mrb[4].mxu1 }
 0x1a2   :  { %v722_v40 = vadd.f32 %v721_v38, %v635_v37  ;;  %v1044_v41 = vpop.f32.mrb[5].mxu1 }
 0x1a4   :  { %v727_v50 = vadd.f32 %v726_v39, %v722_v40 }
 0x1a6   :  { %728 = vst [vmem:[%s1527_s3] sm:$0x1] %v727_v50 }

</bundles_post_ra>
